<compile_context>
chip_gen: v7x
topology: tpu7x:2x2x1
jax: 0.10.0
libtpu: 0.0.40
codegen_flags: <defaults>
</compile_context>

<pallas_src>
import functools

import jax
import jax.numpy as jnp
from jax.experimental import pallas as pl
from jax.experimental.pallas import tpu as pltpu


def se_cov_kernel(sigma_ref, noise_ref, xs_i_ref, xs_all_ref, out_ref, *,
                  neg_half_inv_l, tm):
    i = pl.program_id(0)

    xi = xs_i_ref[...]        # (D, TM)   columns belonging to this row-slab
    xall = xs_all_ref[...]    # (D, N)    all columns (resident across grid)

    # Squared distances via one augmented MXU contraction:
    #   R_ij = sum_d [ x_id^2 * 1 + 1 * x_jd^2 - 2 * x_id * x_jd ]
    # lhs rows = [xi^2 ; 1 ; xi], rhs rows = [1 ; xall^2 ; -2*xall].
    # Keeps the squared norms in-kernel (no extra XLA fusion in the wrapper)
    # and lands R directly in the (TM, N) output layout with no transposes.
    lhs_aug = jnp.concatenate([xi * xi, jnp.ones_like(xi), xi], axis=0)
    rhs_aug = jnp.concatenate(
        [jnp.ones_like(xall), xall * xall, -2.0 * xall], axis=0)
    r = jax.lax.dot_general(lhs_aug, rhs_aug, (((0,), (0,)), ((), ())),
                            preferred_element_type=jnp.float32)   # (TM, N)
    # Tiny negative diagonal residue from f32 cancellation -> clamp (PSD-safe).
    r = jnp.maximum(r, 0.0)

    sigma_f = sigma_ref[0]
    noise = noise_ref[0]

    # Static -0.5/l folded into a single constant multiply; exp on the EUP.
    k = jnp.exp(r * neg_half_inv_l) * (sigma_f * sigma_f)

    # noise^2 * I — one iota-compare + select over the slab (free under exp).
    n = out_ref.shape[1]
    row = i * tm + jax.lax.broadcasted_iota(jnp.int32, (tm, n), 0)
    col = jax.lax.broadcasted_iota(jnp.int32, (tm, n), 1)
    out_ref[...] = jnp.where(row == col, k + noise * noise, k)


def _default_row_tiles():
    """2 row-slabs on v7x (2 TensorCores/chip); 1 on single-TC v5e/v6e."""
    try:
        kind = jax.devices()[0].device_kind.lower()
    except Exception:
        return 1
    return 2 if "v7" in kind else 1


def kernel_gpr_covariance(pmatrix, sigma_f, noise, *, l=1.0, row_tiles=None):
    """Pallas implementation of Kernel_GPR.Covariance() (ids = all users)."""
    d, n = pmatrix.shape
    pmatrix = pmatrix.astype(jnp.float32)

    # Keep the lane dimension a multiple of 128 (unmasked vst); padded columns
    # are zero vectors and the padded region is sliced off afterwards.
    n_pad = ((n + 127) // 128) * 128
    if n_pad != n:
        pmatrix = jnp.pad(pmatrix, ((0, 0), (0, n_pad - n)))

    if row_tiles is None:
        row_tiles = _default_row_tiles()
    # Row-slab lane width (tm) must stay a multiple of 128; fall back to one slab.
    if row_tiles < 1 or n_pad % (128 * row_tiles) != 0:
        row_tiles = 1
    tm = n_pad // row_tiles

    sigma_arr = jnp.reshape(jnp.asarray(sigma_f, jnp.float32), (1,))
    noise_arr = jnp.reshape(jnp.asarray(noise, jnp.float32), (1,))

    neg_half_inv_l = float(-0.5 / l)   # static hyperparameter (recompile on change)

    out = pl.pallas_call(
        functools.partial(se_cov_kernel, neg_half_inv_l=neg_half_inv_l, tm=tm),
        out_shape=jax.ShapeDtypeStruct((n_pad, n_pad), jnp.float32),
        grid=(row_tiles,),
        in_specs=[
            pl.BlockSpec(memory_space=pltpu.MemorySpace.SMEM),   # sigma_f (1,)
            pl.BlockSpec(memory_space=pltpu.MemorySpace.SMEM),   # noise   (1,)
            pl.BlockSpec((d, tm), lambda i: (0, i)),             # xs cols (row slab)
            pl.BlockSpec((d, n_pad), lambda i: (0, 0)),          # xs cols (all, resident)
        ],
        out_specs=pl.BlockSpec((tm, n_pad), lambda i: (i, 0)),   # lane-dense slab
        compiler_params=pltpu.CompilerParams(
            dimension_semantics=("parallel",)),
    )(sigma_arr, noise_arr, pmatrix, pmatrix)

    if n_pad != n:
        out = out[:n, :n]
    return out


def covariance_ref(pmatrix, sigma_f, noise, l=1.0):
    """Plain-JAX reference mirroring SE_Kernel.forward + noise^2 * I."""
    xs = pmatrix.astype(jnp.float32)
    n = xs.shape[1]
    a = jnp.sum(xs ** 2, axis=0, keepdims=True) * jnp.ones((n, n), jnp.float32)
    r = a + a.T - 2.0 * xs.T @ xs
    k = jnp.exp(-0.5 * r / l) * sigma_f ** 2
    return k + noise ** 2 * jnp.eye(n, dtype=jnp.float32)


if __name__ == "__main__":
    # Kernel_GPR(num_users=256, dimension=16): PMatrix = randn(D, N)/sqrt(D),
    # SE_Kernel(init_sigma=1.0, l=1.0), noise = 0.01.
    num_users = 256
    dimension = 16

    key = jax.random.PRNGKey(0)
    pmatrix = (jax.random.normal(key, (dimension, num_users), jnp.float32)
               / jnp.sqrt(jnp.float32(dimension)))
    sigma_f = jnp.float32(1.0)   # Kernel.sigma_f
    noise = jnp.float32(0.01)    # GPR.noise
    length_scale = 1.0           # Kernel.l (static hyperparameter)

    cov = kernel_gpr_covariance(pmatrix, sigma_f, noise, l=length_scale)
    cov = jax.block_until_ready(cov)

    ref = covariance_ref(pmatrix, sigma_f, noise, l=length_scale)
    assert cov.shape == (num_users, num_users)
    assert jnp.allclose(cov, ref, atol=1e-5, rtol=1e-5), "mismatch vs reference"

    # TODO(synk): Posteriori/Train/Select_Clients need matrix inverse + MVN
    # log_prob (no clean single-kernel Pallas equivalent); only Covariance()
    # — the module's parameterized forward compute — is implemented here.
    # TODO(synk): for much larger num_users, add a column-tile grid axis and
    # exploit symmetry (compute upper-triangular blocks only) to halve EUP exp
    # and HBM writeback; not worthwhile at N=256.
    print("KERNEL_OK")
</pallas_src>

<mosaic_0001>
module attributes {stable_mosaic.version = 11 : i64} {
  func.func @se_cov_kernel(%arg0: i32, %arg1: memref<1xf32, #tpu.memory_space<smem>>, %arg2: memref<1xf32, #tpu.memory_space<smem>>, %arg3: memref<16x256xf32, #tpu.memory_space<vmem>>, %arg4: memref<16x256xf32, #tpu.memory_space<vmem>>, %arg5: memref<256x256xf32, #tpu.memory_space<vmem>>) attributes {dimension_semantics = [#tpu.dimension_semantics<parallel>], iteration_bounds = array<i64: 1>, scalar_prefetch = 0 : i64, scratch_operands = 0 : i64, tpu.core_type = #tpu.core_type<tc>, window_params = [{transform_indices = @transform_0, window_bounds = array<i64: 1>}, {transform_indices = @transform_1, window_bounds = array<i64: 1>}, {transform_indices = @transform_2, window_bounds = array<i64: 16, 256>}, {pipeline_mode = #tpu.pipeline_mode<synchronous>, transform_indices = @transform_3, window_bounds = array<i64: 16, 256>}, {transform_indices = @transform_4, window_bounds = array<i64: 256, 256>}]} {
    %c0 = arith.constant 0 : index
    %c0_0 = arith.constant 0 : index
    %0 = vector.load %arg3[%c0, %c0_0] : memref<16x256xf32, #tpu.memory_space<vmem>>, vector<16x256xf32>
    %c0_1 = arith.constant 0 : index
    %c0_2 = arith.constant 0 : index
    %1 = vector.load %arg4[%c0_1, %c0_2] : memref<16x256xf32, #tpu.memory_space<vmem>>, vector<16x256xf32>
    %2 = arith.mulf %0, %0 : vector<16x256xf32>
    %cst = arith.constant 1.000000e+00 : f32
    %3 = vector.broadcast %cst : f32 to vector<16x256xf32>
    %4 = tpu.concatenate %2, %3, %0 in 0 : vector<16x256xf32>, vector<16x256xf32>, vector<16x256xf32> -> vector<48x256xf32>
    %cst_3 = arith.constant 1.000000e+00 : f32
    %5 = vector.broadcast %cst_3 : f32 to vector<16x256xf32>
    %6 = arith.mulf %1, %1 : vector<16x256xf32>
    %cst_4 = arith.constant -2.000000e+00 : f32
    %7 = vector.broadcast %cst_4 : f32 to vector<16x256xf32>
    %8 = arith.mulf %7, %1 : vector<16x256xf32>
    %9 = tpu.concatenate %5, %6, %8 in 0 : vector<16x256xf32>, vector<16x256xf32>, vector<16x256xf32> -> vector<48x256xf32>
    %cst_5 = arith.constant dense<0.000000e+00> : vector<256x256xf32>
    %10 = tpu.matmul %4, %9, %cst_5 {dimension_numbers = #tpu.dot_dimension_numbers<[0], [0], [1], [1], [0, 1, 1, 1], [], []>} : vector<48x256xf32>, vector<48x256xf32>, vector<256x256xf32> -> vector<256x256xf32>
    %cst_6 = arith.constant 0.000000e+00 : f32
    %11 = vector.broadcast %cst_6 : f32 to vector<256x256xf32>
    %12 = arith.maximumf %10, %11 : vector<256x256xf32>
    %c0_7 = arith.constant 0 : index
    %13 = memref.load %arg1[%c0_7] : memref<1xf32, #tpu.memory_space<smem>>
    %c0_8 = arith.constant 0 : index
    %14 = memref.load %arg2[%c0_8] : memref<1xf32, #tpu.memory_space<smem>>
    %cst_9 = arith.constant -5.000000e-01 : f32
    %15 = vector.broadcast %cst_9 : f32 to vector<256x256xf32>
    %16 = arith.mulf %12, %15 : vector<256x256xf32>
    %17 = math.exp %16 : vector<256x256xf32>
    %18 = arith.mulf %13, %13 : f32
    %19 = vector.broadcast %18 : f32 to vector<256x256xf32>
    %20 = arith.mulf %17, %19 : vector<256x256xf32>
    %c256_i32 = arith.constant 256 : i32
    %21 = arith.muli %arg0, %c256_i32 : i32
    %22 = tpu.iota {dimensions = array<i32: 0>} : vector<256x256xi32>
    %23 = vector.broadcast %21 : i32 to vector<256x256xi32>
    %24 = arith.addi %23, %22 : vector<256x256xi32>
    %25 = tpu.iota {dimensions = array<i32: 1>} : vector<256x256xi32>
    %26 = arith.cmpi eq, %24, %25 : vector<256x256xi32>
    %27 = arith.mulf %14, %14 : f32
    %28 = vector.broadcast %27 : f32 to vector<256x256xf32>
    %29 = arith.addf %20, %28 : vector<256x256xf32>
    %30 = arith.select %26, %29, %20 : vector<256x256xi1>, vector<256x256xf32>
    %c0_10 = arith.constant 0 : index
    %c0_11 = arith.constant 0 : index
    %31 = vector.load %arg5[%c0_10, %c0_11] : memref<256x256xf32, #tpu.memory_space<vmem>>, vector<256x256xf32>
    tpu.vector_store %arg5[%c0_10, %c0_11], %30 {strides = array<i32>} : memref<256x256xf32, #tpu.memory_space<vmem>>, vector<256x256xf32>,
    return
  }
  func.func @transform_0(%arg0: i32) -> i32 {
    %c0_i32 = arith.constant 0 : i32
    %c0_i32_0 = arith.constant 0 : i32
    return %c0_i32 : i32
  }
  func.func @transform_1(%arg0: i32) -> i32 {
    %c0_i32 = arith.constant 0 : i32
    %c0_i32_0 = arith.constant 0 : i32
    return %c0_i32 : i32
  }
  func.func @transform_2(%arg0: i32) -> (i32, i32) {
    %c0_i32 = arith.constant 0 : i32
    %c0_i32_0 = arith.constant 0 : i32
    return %c0_i32, %arg0 : i32, i32
  }
  func.func @transform_3(%arg0: i32) -> (i32, i32) {
    %c0_i32 = arith.constant 0 : i32
    %c0_i32_0 = arith.constant 0 : i32
    %c0_i32_1 = arith.constant 0 : i32
    return %c0_i32, %c0_i32_0 : i32, i32
  }
  func.func @transform_4(%arg0: i32) -> (i32, i32) {
    %c0_i32 = arith.constant 0 : i32
    %c0_i32_0 = arith.constant 0 : i32
    return %arg0, %c0_i32 : i32, i32
  }
}

</mosaic_0001>

<bundles_post_ra>
// kernel: tpu_custom_call.1
= control target key start
LH: loop header
LB: loop body
LE: loop exit
PB: predicated region body
PF: predicated region fallthrough
CT: control target
= control target key end

     0   :  { %11 = vsyncpa [#allocation5], 0  ;;  %s2018_s0 = inlined_call_operand.<no memory space> [shape: f32[1], index: 0, kind: input, shape index: {}]   ;;  %s2019_s1 = inlined_call_operand.<no memory space> [shape: f32[1], index: 1, kind: input, shape index: {}]   ;;  %s2020_s2 = inlined_call_operand.hbm [shape: f32[16,256], index: 2, kind: input, shape index: {}]   ;;  %s2021_s3 = inlined_call_operand.hbm [shape: f32[16,256], index: 3, kind: input, shape index: {}]   ;;  %s2022_s4 = inlined_call_operand.hbm [shape: f32[256,256], index: 4, kind: output, shape index: {}]  }
   0x1   :  { %12 = vsyncpa [#allocation8], 0 }
   0x2   :  { %13 = vsyncpa [#allocation6], 0  ;;  %s1412_s15 = smov [#allocation4]   ;;  %s1340_s19 = scalar_lea.hbm %s2020_s2, 512 }
   0x3   :  { %s23_s16 = sshll.u32 %s1412_s15, 4  ;;  %p1341_p0 = scmp.ne.s32.totalorder %s2020_s2, %s1340_s19  ;;  %s24_s16 = int_to_ptr.vmem [resolvable:$true] %s23_s16 }
   0x4   :  { %p1344_p1 = scmp.lt.u32.totalorder %s1340_s19, %s2020_s2 }
   0x6   :  { %p1346_p2 = pnand %p1344_p1, %p1341_p0 }
   0x8   :  { %1349 = shalt.err (!%p1346_p2)
}
   0x9   :  { %s1350_s24 = scalar_lea.vmem %s24_s16, 512  ;;  %p1355_p4 = scmp.lt.s32.totalorder %s24_s16, %s24_s16 }
   0xa   :  { %p1351_p3 = scmp.ne.s32.totalorder %s24_s16, %s1350_s24  ;;  %p1356_p5 = scmp.lt.s32.totalorder %s1350_s24, %s1350_s24 }
   0xc   :  { %p1357_p6 = por %p1356_p5, %p1355_p4 }
   0xe   :  { %p1358_p7 = pnand %p1357_p6, %p1351_p3 }
  0x10   :  { %1361 = shalt.err (!%p1358_p7)
}
  0x11   :  { %s1413_s25 = smov 256   ;;  %s1414_s26 = smov 16  }
  0x12   :  { %29 = dma.hbm_to_vmem [thread:$0]  %s2020_s2, 512, %s24_s16, [#allocation5], %s1413_s25, %s1413_s25, %s1414_s26  }
  0x13   :  { %s1415_s29 = smov [#allocation7]   ;;  %s1362_s7 = scalar_lea.hbm %s2021_s3, 512 }
  0x14   :  { %s35_s30 = sshll.u32 %s1415_s29, 4  ;;  %p1363_p8 = scmp.ne.s32.totalorder %s2021_s3, %s1362_s7  ;;  %s36_s30 = int_to_ptr.vmem [resolvable:$true] %s35_s30 }
  0x15   :  { %p1366_p9 = scmp.lt.u32.totalorder %s1362_s7, %s2021_s3 }
  0x17   :  { %p1368_p10 = pnand %p1366_p9, %p1363_p8 }
  0x19   :  { %1371 = shalt.err (!%p1368_p10)
}
  0x1a   :  { %s1372_s12 = scalar_lea.vmem %s36_s30, 512  ;;  %p1377_p12 = scmp.lt.s32.totalorder %s36_s30, %s36_s30 }
  0x1b   :  { %p1373_p11 = scmp.ne.s32.totalorder %s36_s30, %s1372_s12  ;;  %p1378_p13 = scmp.lt.s32.totalorder %s1372_s12, %s1372_s12 }
  0x1d   :  { %p1379_p0 = por %p1378_p13, %p1377_p12 }
  0x1f   :  { %p1380_p1 = pnand %p1379_p0, %p1373_p11 }
  0x21   :  { %1383 = shalt.err (!%p1380_p1)
}
  0x22   :  { %41 = dma.hbm_to_vmem [thread:$0]  %s2021_s3, 512, %s36_s30, [#allocation8], %s1413_s25, %s1413_s25, %s1414_s26  }
  0x23   :  { %1406 = dma.done.wait [#allocation5], 512  }
  0x24   :  { %1407 = vsyncadd [#allocation5], 4294966784 }
  0x25   :  { %1408 = dma.done.wait [#allocation8], 512  }
  0x26   :  { %1409 = vsyncadd [#allocation8], 4294966784  ;;  %v1416_v0 = vmov 1.0|1.0   ;;  %v1417_v1 = vmov 0.0   ;;  %v49_v2 = vld [vmem:[#allocation4 + $0x8] sm:$0xff]  ;;  %v811_v59 = vlaneseq  ;;  %s744_s15 = smul.f32 %s2018_s0, %s2018_s0 }
  0x27   :  { %1188 = vmatprep.subr.bf16.mxu0 %v1416_v0  ;;  %1198 = vmatprep.subr.bf16.mxu1 %v1416_v0  ;;  %v48_v3 = vld [vmem:[#allocation4] sm:$0xff]  ;;  %v51_v4 = vld [vmem:[#allocation4 + $0x18] sm:$0xff]  ;;  %v57_v5 = vmul.f32 %v49_v2, %v49_v2  ;;  %v50_v7 = vld [vmem:[#allocation4 + $0x10] sm:$0xff]  ;;  %v1418_v26 = vmov 1.0   ;;  %vm132_vm0 = vcmask 392192   ;;  %s944_s18 = smul.f32 %s2019_s1, %s2019_s1  ;;  %s1419_s0 = smov [#allocation9]  }
  0x28   :  { %1189 = vmatpush1.bf16.msra.mxu0 %v1416_v0  ;;  %1201 = vmatpush1.bf16.msra.mxu1 %v1416_v0  ;;  %v56_v6 = vmul.f32 %v48_v3, %v48_v3  ;;  %v53_v8 = vld [vmem:[#allocation7 + $0x8] sm:$0xff]  ;;  %v55_v9 = vld [vmem:[#allocation7 + $0x18] sm:$0xff]  ;;  %v59_v10 = vmul.f32 %v51_v4, %v51_v4  ;;  %v52_v13 = vld [vmem:[#allocation7] sm:$0xff]  ;;  %v58_v16 = vmul.f32 %v50_v7, %v50_v7  ;;  %v1539_v60 = vshrl.u32 %v811_v59, 7  ;;  %s1143_s1 = sshll.u32 %s1419_s0, 4  ;;  %s1144_s1 = int_to_ptr.vmem [resolvable:$true] %s1143_s1 }
  0x29   :  { %293 = vmatprep.mubr.f32.mxu0 %v1417_v1  ;;  %389 = vmatprep.mubr.f32.mxu1 %v1417_v1  ;;  %v61_v11 = vmul.f32 %v53_v8, %v53_v8  ;;  %v63_v12 = vmul.f32 %v55_v9, %v55_v9  ;;  %v54_v14 = vld [vmem:[#allocation7 + $0x10] sm:$0xff]  ;;  %v65_v15 = vmul.f32 -2.0, %v53_v8  ;;  %v60_v17 = vmul.f32 %v52_v13, %v52_v13  ;;  %s1384_s19 = scalar_lea.vmem %s1144_s1, 8192  ;;  %p1389_p3 = scmp.lt.s32.totalorder %s1144_s1, %s1144_s1 }
  0x2a   :  { %100 = vxpose.xlu0.b32.start [1/6] (short) %v57_v5, 128  ;;  %68 = vxpose.xlu1.b32.start [1/6] (short) %v56_v6, 128  ;;  %v62_v18 = vmul.f32 %v54_v14, %v54_v14  ;;  %v67_v19 = vmul.f32 -2.0, %v55_v9  ;;  %v64_v21 = vmul.f32 -2.0, %v52_v13  ;;  %v66_v22 = vmul.f32 -2.0, %v54_v14  ;;  %p1385_p2 = scmp.ne.s32.totalorder %s1144_s1, %s1384_s19  ;;  %p1390_p4 = scmp.lt.s32.totalorder %s1384_s19, %s1384_s19 }
  0x2b   :  { %v1190_v20 = vpack.c.bf16 %v63_v12, %v61_v11  ;;  %v1541_v61 = vand.u32 127, %v811_v59  ;;  %v1544_v62 = vadd.s32 128, %v1539_v60  ;;  %v1550_v0 = vadd.s32 8, %v1539_v60 }
  0x2c   :  { %v1192_v23 = vpack.c.bf16 %v62_v18, %v60_v17  ;;  %v1194_v24 = vpack.c.bf16 %v67_v19, %v65_v15  ;;  %v1196_v25 = vpack.c.bf16 %v66_v22, %v64_v21  ;;  %v1565_v5 = vadd.s32 152, %v1539_v60  ;;  %p1391_p5 = por %p1390_p4, %p1389_p3 }
  0x2d   :  { %1191 = vmatprep.subr.bf16.mxu0 %v1190_v20  ;;  %1199 = vmatprep.subr.bf16.mxu1 %v1190_v20  ;;  %v1547_v63 = vadd.s32 128, %v1541_v61  ;;  %v1568_v6 = vadd.s32 32, %v1539_v60  ;;  %v1574_v8 = vadd.s32 40, %v1539_v60  ;;  %v1577_v9 = vadd.s32 168, %v1539_v60 }
  0x2e   :  { %101 = vxpose.xlu0.b32.cont [2/6] (short) %v59_v10, 128  ;;  %69 = vxpose.xlu1.b32.cont [2/6] (short) %v58_v16, 128  ;;  %v1580_v12 = vadd.s32 48, %v1539_v60  ;;  %v1583_v13 = vadd.s32 176, %v1539_v60  ;;  %v1586_v14 = vadd.s32 56, %v1539_v60  ;;  %v1589_v15 = vadd.s32 184, %v1539_v60  ;;  %p1392_p6 = pnand %p1391_p5, %p1385_p2 }
  0x2f   :  { %1193 = vmatpush1.bf16.msra.mxu0 %v1192_v23  ;;  %1202 = vmatpush1.bf16.msra.mxu1 %v1192_v23  ;;  %v1596_v20 = vadd.s32 64, %v1539_v60  ;;  %v1599_v21 = vadd.s32 192, %v1539_v60  ;;  %vm880_vm1 = vcmp.eq.s32.totalorder %v1539_v60, %v1541_v61  ;;  %vm913_vm2 = vcmp.eq.s32.totalorder %v1544_v62, %v1547_v63 }
  0x30   :  { %1195 = vmatprep.subr.bf16.mxu0 %v1194_v24  ;;  %1200 = vmatprep.subr.bf16.mxu1 %v1194_v24  ;;  %v1606_v24 = vadd.s32 72, %v1539_v60  ;;  %vm882_vm3 = vcmp.eq.s32.totalorder %v1550_v0, %v1541_v61  ;;  %vm919_vm8 = vcmp.eq.s32.totalorder %v1565_v5, %v1547_v63  ;;  %vm888_vm9 = vcmp.eq.s32.totalorder %v1568_v6, %v1541_v61 }
  0x31   :  { %vm890_vm11 = vcmp.eq.s32.totalorder %v1574_v8, %v1541_v61  ;;  %vm923_vm12 = vcmp.eq.s32.totalorder %v1577_v9, %v1547_v63  ;;  %vm892_vm13 = vcmp.eq.s32.totalorder %v1580_v12, %v1541_v61  ;;  %vm925_vm14 = vcmp.eq.s32.totalorder %v1583_v13, %v1547_v63 }
  0x32   :  { %102 = vxpose.xlu0.b32.cont [3/6] (short) %v1418_v26, 128  ;;  %70 = vxpose.xlu1.b32.cont [3/6] (short) %v1418_v26, 128  ;;  %vm894_vm15 = vcmp.eq.s32.totalorder %v1586_v14, %v1541_v61 }
  0x33   :  { %1197 = vmatpush1.bf16.msra.mxu0 %v1196_v25  ;;  %1203 = vmatpush1.bf16.msra.mxu1 %v1196_v25  ;;  %v1609_v25 = vadd.s32 200, %v1539_v60 }
  0x36   :  { %103 = vxpose.xlu0.b32.cont [4/6] (short) %v1418_v26, 128  ;;  %71 = vxpose.xlu1.b32.cont [4/6] (short) %v1418_v26, 128 }
  0x3a   :  { %104 = vxpose.xlu0.b32.cont [5/6] (short) %v49_v2, 128  ;;  %72 = vxpose.xlu1.b32.cont [5/6] (short) %v48_v3, 128  ;;  %v1556_v2 = vadd.s32 16, %v1539_v60  ;;  %v1559_v3 = vadd.s32 144, %v1539_v60 }
  0x3c   :  { %vm884_vm5 = vcmp.eq.s32.totalorder %v1556_v2, %v1541_v61  ;;  %vm917_vm6 = vcmp.eq.s32.totalorder %v1559_v3, %v1547_v63 }
  0x3e   :  { %105 = vxpose.xlu0.b32.end [6/6] (short) %v51_v4, 128  ;;  %73 = vxpose.xlu1.b32.end [6/6] (short) %v50_v7, 128  ;;  %v1562_v4 = vadd.s32 24, %v1539_v60  ;;  %v1571_v7 = vadd.s32 160, %v1539_v60 }
  0x40   :  { %vm886_vm7 = vcmp.eq.s32.totalorder %v1562_v4, %v1541_v61  ;;  %vm921_vm10 = vcmp.eq.s32.totalorder %v1571_v7, %v1547_v63 }
  0xaa   :  { %v116_v27 = vpop.trf.xlu0  ;;  %v84_v28 = vpop.trf.xlu1 }
  0xab   :  { %1156 = vmatmul.mubr.msk.f32.vlgmr.msra.gmra.mrb[0].mxu0 %vm132_vm0, %v84_v28  ;;  %1172 = vmatmul.mubr.msk.f32.vlgmr.msra.gmra.mrb[0].mxu1 %vm132_vm0, %v116_v27  ;;  %v1612_v28 = vadd.s32 80, %v1539_v60 }
  0xac   :  { %395 = vmatprep.mubr.f32.mxu1 %v1417_v1  ;;  %299 = vmatprep.mubr.f32.mxu0 %v1417_v1 }
  0xae   :  { %v117_v29 = vpop.trf.xlu0  ;;  %v85_v30 = vpop.trf.xlu1 }
  0xaf   :  { %1157 = vmatmul.mubr.msk.f32.gmra.mrb[2].mxu0 %vm132_vm0, %v85_v30  ;;  %1173 = vmatmul.mubr.msk.f32.gmra.mrb[2].mxu1 %vm132_vm0, %v117_v29  ;;  %v1615_v29 = vadd.s32 208, %v1539_v60 }
  0xb0   :  { %401 = vmatprep.mubr.f32.mxu1 %v1417_v1  ;;  %305 = vmatprep.mubr.f32.mxu0 %v1417_v1 }
  0xb2   :  { %v118_v31 = vpop.trf.xlu0  ;;  %v86_v32 = vpop.trf.xlu1 }
  0xb3   :  { %1158 = vmatmul.mubr.msk.f32.gmra.mrb[4].mxu0 %vm132_vm0, %v86_v32  ;;  %1174 = vmatmul.mubr.msk.f32.gmra.mrb[4].mxu1 %vm132_vm0, %v118_v31 }
  0xb4   :  { %407 = vmatprep.mubr.f32.mxu1 %v1417_v1  ;;  %311 = vmatprep.mubr.f32.mxu0 %v1417_v1 }
  0xb6   :  { %v119_v33 = vpop.trf.xlu0  ;;  %v87_v34 = vpop.trf.xlu1 }
  0xb7   :  { %1159 = vmatmul.mubr.msk.f32.gmra.mrb[6].mxu0 %vm132_vm0, %v87_v34  ;;  %1175 = vmatmul.mubr.msk.f32.gmra.mrb[6].mxu1 %vm132_vm0, %v119_v33  ;;  %v1618_v34 = vadd.s32 88, %v1539_v60 }
  0xb8   :  { %413 = vmatprep.mubr.f32.mxu1 %v1417_v1  ;;  %317 = vmatprep.mubr.f32.mxu0 %v1417_v1 }
  0xba   :  { %v120_v35 = vpop.trf.xlu0  ;;  %v88_v36 = vpop.trf.xlu1 }
  0xbb   :  { %1160 = vmatmul.mubr.msk.f32.gmra.mrb[8].mxu0 %vm132_vm0, %v88_v36  ;;  %1176 = vmatmul.mubr.msk.f32.gmra.mrb[8].mxu1 %vm132_vm0, %v120_v35  ;;  %v1621_v35 = vadd.s32 216, %v1539_v60 }
  0xbc   :  { %419 = vmatprep.mubr.f32.mxu1 %v1417_v1  ;;  %323 = vmatprep.mubr.f32.mxu0 %v1417_v1 }
  0xbe   :  { %v121_v37 = vpop.trf.xlu0  ;;  %v89_v38 = vpop.trf.xlu1 }
  0xbf   :  { %1161 = vmatmul.mubr.msk.f32.gmra.mrb[10].mxu0 %vm132_vm0, %v89_v38  ;;  %1177 = vmatmul.mubr.msk.f32.gmra.mrb[10].mxu1 %vm132_vm0, %v121_v37 }
  0xc0   :  { %425 = vmatprep.mubr.f32.mxu1 %v1417_v1  ;;  %329 = vmatprep.mubr.f32.mxu0 %v1417_v1 }
  0xc2   :  { %v122_v39 = vpop.trf.xlu0  ;;  %v90_v40 = vpop.trf.xlu1 }
  0xc3   :  { %1162 = vmatmul.mubr.msk.f32.gmra.mrb[12].mxu0 %vm132_vm0, %v90_v40  ;;  %1178 = vmatmul.mubr.msk.f32.gmra.mrb[12].mxu1 %vm132_vm0, %v122_v39  ;;  %v1623_v40 = vstv %s744_s15 }
  0xc4   :  { %431 = vmatprep.mubr.f32.mxu1 %v1417_v1  ;;  %335 = vmatprep.mubr.f32.mxu0 %v1417_v1 }
  0xc6   :  { %v123_v41 = vpop.trf.xlu0  ;;  %v91_v42 = vpop.trf.xlu1 }
  0xc7   :  { %1163 = vmatmul.mubr.msk.f32.gmra.mrb[14].mxu0 %vm132_vm0, %v91_v42  ;;  %1179 = vmatmul.mubr.msk.f32.gmra.mrb[14].mxu1 %vm132_vm0, %v123_v41  ;;  %v1625_v41 = vstv %s944_s18 }
  0xc8   :  { %437 = vmatprep.mubr.f32.mxu1 %v1417_v1  ;;  %341 = vmatprep.mubr.f32.mxu0 %v1417_v1 }
  0xca   :  { %v124_v43 = vpop.trf.xlu0  ;;  %v92_v44 = vpop.trf.xlu1 }
  0xcb   :  { %1164 = vmatmul.mubr.msk.f32.gmra.mrb[16].mxu0 %vm132_vm0, %v92_v44  ;;  %1180 = vmatmul.mubr.msk.f32.gmra.mrb[16].mxu1 %vm132_vm0, %v124_v43 }
  0xcc   :  { %443 = vmatprep.mubr.f32.mxu1 %v1417_v1  ;;  %347 = vmatprep.mubr.f32.mxu0 %v1417_v1 }
  0xce   :  { %v125_v45 = vpop.trf.xlu0  ;;  %v93_v46 = vpop.trf.xlu1 }
  0xcf   :  { %1165 = vmatmul.mubr.msk.f32.gmra.mrb[18].mxu0 %vm132_vm0, %v93_v46  ;;  %1181 = vmatmul.mubr.msk.f32.gmra.mrb[18].mxu1 %vm132_vm0, %v125_v45 }
  0xd0   :  { %449 = vmatprep.mubr.f32.mxu1 %v1417_v1  ;;  %353 = vmatprep.mubr.f32.mxu0 %v1417_v1 }
  0xd2   :  { %v126_v47 = vpop.trf.xlu0  ;;  %v94_v48 = vpop.trf.xlu1 }
  0xd3   :  { %1166 = vmatmul.mubr.msk.f32.gmra.mrb[20].mxu0 %vm132_vm0, %v94_v48  ;;  %1182 = vmatmul.mubr.msk.f32.gmra.mrb[20].mxu1 %vm132_vm0, %v126_v47 }
  0xd4   :  { %455 = vmatprep.mubr.f32.mxu1 %v1417_v1  ;;  %359 = vmatprep.mubr.f32.mxu0 %v1417_v1 }
  0xd6   :  { %v127_v49 = vpop.trf.xlu0  ;;  %v95_v50 = vpop.trf.xlu1 }
  0xd7   :  { %1167 = vmatmul.mubr.msk.f32.gmra.mrb[22].mxu0 %vm132_vm0, %v95_v50  ;;  %1183 = vmatmul.mubr.msk.f32.gmra.mrb[22].mxu1 %vm132_vm0, %v127_v49 }
  0xd8   :  { %461 = vmatprep.mubr.f32.mxu1 %v1417_v1  ;;  %365 = vmatprep.mubr.f32.mxu0 %v1417_v1 }
  0xda   :  { %v128_v51 = vpop.trf.xlu0  ;;  %v96_v52 = vpop.trf.xlu1 }
  0xdb   :  { %1168 = vmatmul.mubr.msk.f32.gmra.mrb[24].mxu0 %vm132_vm0, %v96_v52  ;;  %1184 = vmatmul.mubr.msk.f32.gmra.mrb[24].mxu1 %vm132_vm0, %v128_v51  ;;  %v1628_v52 = vadd.s32 96, %v1539_v60 }
  0xdc   :  { %467 = vmatprep.mubr.f32.mxu1 %v1417_v1  ;;  %371 = vmatprep.mubr.f32.mxu0 %v1417_v1 }
  0xde   :  { %v129_v53 = vpop.trf.xlu0  ;;  %v97_v54 = vpop.trf.xlu1 }
  0xdf   :  { %1169 = vmatmul.mubr.msk.f32.gmra.mrb[26].mxu0 %vm132_vm0, %v97_v54  ;;  %1185 = vmatmul.mubr.msk.f32.gmra.mrb[26].mxu1 %vm132_vm0, %v129_v53  ;;  %v1631_v53 = vadd.s32 224, %v1539_v60 }
  0xe0   :  { %473 = vmatprep.mubr.f32.mxu1 %v1417_v1  ;;  %377 = vmatprep.mubr.f32.mxu0 %v1417_v1 }
  0xe2   :  { %v130_v55 = vpop.trf.xlu0  ;;  %v98_v56 = vpop.trf.xlu1 }
  0xe3   :  { %1170 = vmatmul.mubr.msk.f32.gmra.mrb[28].mxu0 %vm132_vm0, %v98_v56  ;;  %1186 = vmatmul.mubr.msk.f32.gmra.mrb[28].mxu1 %vm132_vm0, %v130_v55 }
  0xe4   :  { %479 = vmatprep.mubr.f32.mxu1 %v1417_v1  ;;  %383 = vmatprep.mubr.f32.mxu0 %v1417_v1  ;;  %v1553_v1 = vadd.s32 136, %v1539_v60 }
  0xe6   :  { %v131_v57 = vpop.trf.xlu0  ;;  %v99_v58 = vpop.trf.xlu1  ;;  %vm915_vm4 = vcmp.eq.s32.totalorder %v1553_v1, %v1547_v63 }
  0xe7   :  { %1171 = vmatmul.mubr.msk.f32.gmra.mrb[30].mxu0 %vm132_vm0, %v99_v58  ;;  %1187 = vmatmul.mubr.msk.f32.gmra.mrb[30].mxu1 %vm132_vm0, %v131_v57  ;;  %vm927_vm0 = vcmp.eq.s32.totalorder %v1589_v15, %v1547_v63 }
 0x17e   :  { %v295_v10 = vpop.f32.mrb[0].mxu0  ;;  %v391_v11 = vpop.f32.mrb[0].mxu1 }
 0x17f   :  { %v486_v16 = vmax.f32 %v295_v10, 0.0  ;;  %v518_v17 = vmax.f32 %v391_v11, 0.0  ;;  %v297_v18 = vpop.f32.mrb[1].mxu0  ;;  %v393_v19 = vpop.f32.mrb[1].mxu1 }
 0x180   :  { %v487_v22 = vmax.f32 %v297_v18, 0.0  ;;  %v519_v23 = vmax.f32 %v393_v19, 0.0 }
 0x181   :  { %v552_v26 = vmul.f32 -0.5, %v486_v16  ;;  %v584_v27 = vmul.f32 -0.5, %v518_v17 }
 0x182   :  { %v553_v30 = vmul.f32 -0.5, %v487_v22  ;;  %v585_v31 = vmul.f32 -0.5, %v519_v23  ;;  %v301_v32 = vpop.f32.mrb[2].mxu0  ;;  %v397_v33 = vpop.f32.mrb[2].mxu1 }
 0x183   :  { %v616_v36 = vmul.f32 1.442695, %v552_v26  ;;  %v680_v37 = vmul.f32 1.442695, %v584_v27  ;;  %v488_v38 = vmax.f32 %v301_v32, 0.0  ;;  %v520_v39 = vmax.f32 %v397_v33, 0.0 }
 0x184   :  { %v618_v42 = vmul.f32 1.442695, %v553_v30  ;;  %v682_v43 = vmul.f32 1.442695, %v585_v31  ;;  %v303_v44 = vpop.f32.mrb[3].mxu0  ;;  %v399_v45 = vpop.f32.mrb[3].mxu1 }
 0x185   :  { %1212 = vpow2.f32 %v616_v36  ;;  %v554_v46 = vmul.f32 -0.5, %v488_v38  ;;  %v586_v47 = vmul.f32 -0.5, %v520_v39  ;;  %v489_v48 = vmax.f32 %v303_v44, 0.0 }
 0x186   :  { %1214 = vpow2.f32 %v680_v37  ;;  %v521_v49 = vmax.f32 %v399_v45, 0.0  ;;  %v307_v50 = vpop.f32.mrb[4].mxu0  ;;  %v403_v51 = vpop.f32.mrb[4].mxu1 }
 0x187   :  { %1216 = vpow2.f32 %v618_v42  ;;  %v620_v54 = vmul.f32 1.442695, %v554_v46  ;;  %v684_v55 = vmul.f32 1.442695, %v586_v47  ;;  %v555_v56 = vmul.f32 -0.5, %v489_v48  ;;  %v309_v57 = vpop.f32.mrb[5].mxu0 }
 0x188   :  { %1218 = vpow2.f32 %v682_v43  ;;  %v587_v58 = vmul.f32 -0.5, %v521_v49  ;;  %v490_v59 = vmax.f32 %v307_v50, 0.0  ;;  %v522_v10 = vmax.f32 %v403_v51, 0.0  ;;  %v405_v11 = vpop.f32.mrb[5].mxu1 }
 0x189   :  { %1220 = vpow2.f32 %v620_v54  ;;  %v622_v16 = vmul.f32 1.442695, %v555_v56  ;;  %v491_v17 = vmax.f32 %v309_v57, 0.0  ;;  %v523_v18 = vmax.f32 %v405_v11, 0.0 }
 0x18a   :  { %1222 = vpow2.f32 %v684_v55  ;;  %v686_v19 = vmul.f32 1.442695, %v587_v58  ;;  %v556_v22 = vmul.f32 -0.5, %v490_v59  ;;  %v588_v23 = vmul.f32 -0.5, %v522_v10  ;;  %v313_v26 = vpop.f32.mrb[6].mxu0  ;;  %v409_v27 = vpop.f32.mrb[6].mxu1 }
 0x18b   :  { %1224 = vpow2.f32 %v622_v16  ;;  %v557_v30 = vmul.f32 -0.5, %v491_v17  ;;  %v589_v31 = vmul.f32 -0.5, %v523_v18  ;;  %v492_v32 = vmax.f32 %v313_v26, 0.0  ;;  %v315_v33 = vpop.f32.mrb[7].mxu0  ;;  %v411_v36 = vpop.f32.mrb[7].mxu1 }
 0x18c   :  { %1226 = vpow2.f32 %v686_v19  ;;  %v624_v37 = vmul.f32 1.442695, %v556_v22  ;;  %v688_v38 = vmul.f32 1.442695, %v588_v23  ;;  %v524_v39 = vmax.f32 %v409_v27, 0.0 }
 0x18d   :  { %v626_v42 = vmul.f32 1.442695, %v557_v30  ;;  %v690_v43 = vmul.f32 1.442695, %v589_v31  ;;  %v558_v44 = vmul.f32 -0.5, %v492_v32  ;;  %v493_v45 = vmax.f32 %v315_v33, 0.0 }
 0x18e   :  { %1228 = vpow2.f32 %v624_v37  ;;  %v590_v46 = vmul.f32 -0.5, %v524_v39  ;;  %v525_v47 = vmax.f32 %v411_v36, 0.0  ;;  %v319_v48 = vpop.f32.mrb[8].mxu0  ;;  %v415_v49 = vpop.f32.mrb[8].mxu1  ;;  %v1640_v50 = vadd.s32 104, %v1539_v60 }
 0x18f   :  { %v1213_v51 = vpop.eup %1212  ;;  %1230 = vpow2.f32 %v688_v38  ;;  %v628_v54 = vmul.f32 1.442695, %v558_v44  ;;  %v559_v55 = vmul.f32 -0.5, %v493_v45  ;;  %v494_v56 = vmax.f32 %v319_v48, 0.0  ;;  %v321_v57 = vpop.f32.mrb[9].mxu0 }
 0x190   :  { %v1642_v58 = vpop.f32.mrb[9].mxu1  ;;  %v1215_v59 = vpop.eup %1214  ;;  %v746_v10 = vmul.f32 %v1213_v51, %v1623_v40  ;;  %1232 = vpow2.f32 %v626_v42  ;;  %v692_v11 = vmul.f32 1.442695, %v590_v46  ;;  %v591_v16 = vmul.f32 -0.5, %v525_v47 }
 0x191   :  { %v1217_v17 = vpop.eup %1216  ;;  %v778_v18 = vmul.f32 %v1215_v59, %v1623_v40  ;;  %1234 = vpow2.f32 %v690_v43  ;;  %v630_v19 = vmul.f32 1.442695, %v559_v55  ;;  %v560_v22 = vmul.f32 -0.5, %v494_v56 }
 0x192   :  { %v1219_v23 = vpop.eup %1218  ;;  %v946_v26 = vadd.f32 %v1625_v41, %v746_v10  ;;  %v747_v27 = vmul.f32 %v1217_v17, %v1623_v40  ;;  %1236 = vpow2.f32 %v628_v54  ;;  %v694_v30 = vmul.f32 1.442695, %v591_v16  ;;  %v325_v31 = vpop.f32.mrb[10].mxu0 }
 0x193   :  { %v421_v32 = vpop.f32.mrb[10].mxu1  ;;  %v1221_v33 = vpop.eup %1220  ;;  %1106 = vst [vmem:[#allocation9 + $0x100] sm:$0xff] %v778_v18  ;;  %v779_v36 = vmul.f32 %v1219_v23, %v1623_v40  ;;  %1238 = vpow2.f32 %v692_v11  ;;  %v632_v37 = vmul.f32 1.442695, %v560_v22  ;;  %v526_v38 = vmax.f32 %v415_v49, 0.0 }
 0x194   :  { %v1653_v39 = vpop.f32.mrb[11].mxu0  ;;  %v1655_v42 = vpop.f32.mrb[11].mxu1  ;;  %v1010_v44 = vsel %vm880_vm1, %v946_v26, %v746_v10  ;;  %1075 = vst [vmem:[#allocation9 + $0x8] sm:$0xff] %v747_v27  ;;  %v748_v45 = vmul.f32 %v1221_v33, %v1623_v40  ;;  %1240 = vpow2.f32 %v630_v19  ;;  %v495_v46 = vmax.f32 %v321_v57, 0.0 }
 0x195   :  { %v1223_v43 = vpop.eup %1222  ;;  %1074 = vst [vmem:[#allocation9] sm:$0xff] %v1010_v44  ;;  %v979_v48 = vadd.f32 %v1625_v41, %v779_v36  ;;  %1242 = vpow2.f32 %v694_v30  ;;  %v592_v51 = vmul.f32 -0.5, %v526_v38  ;;  %v527_v18 = vmax.f32 %v1642_v58, 0.0 }
 0x196   :  { %v1225_v47 = vpop.eup %1224  ;;  %v780_v49 = vmul.f32 %v1223_v43, %v1623_v40  ;;  %v948_v55 = vadd.f32 %v1625_v41, %v748_v45  ;;  %1244 = vpow2.f32 %v632_v37  ;;  %v561_v57 = vmul.f32 -0.5, %v495_v46  ;;  %v1669_v59 = vpop.f32.mrb[12].mxu0 }
 0x197   :  { %v1227_v54 = vpop.eup %1226  ;;  %v749_v56 = vmul.f32 %v1225_v47, %v1623_v40  ;;  %v1671_v10 = vpop.f32.mrb[12].mxu1  ;;  %v1043_v11 = vsel %vm913_vm2, %v979_v48, %v779_v36  ;;  %v696_v17 = vmul.f32 1.442695, %v592_v51  ;;  %v496_v62 = vmax.f32 %v325_v31, 0.0 }
 0x198   :  { %1108 = vst [vmem:[#allocation9 + $0x110] sm:$0xff] %v780_v49  ;;  %v781_v16 = vmul.f32 %v1227_v54, %v1623_v40  ;;  %v1678_v19 = vpop.f32.mrb[13].mxu0  ;;  %v1680_v22 = vpop.f32.mrb[13].mxu1  ;;  %1107 = vst [vmem:[#allocation9 + $0x108] sm:$0xff] %v1043_v11  ;;  %v1012_v26 = vsel %vm882_vm3, %v948_v55, %v748_v45  ;;  %v634_v27 = vmul.f32 1.442695, %v561_v57  ;;  %vm896_vm1 = vcmp.eq.s32.totalorder %v1596_v20, %v1541_v61 }
 0x199   :  { %v1229_v23 = vpop.eup %1228  ;;  %1077 = vst [vmem:[#allocation9 + $0x18] sm:$0xff] %v749_v56  ;;  %v528_v30 = vmax.f32 %v421_v32, 0.0  ;;  %1076 = vst [vmem:[#allocation9 + $0x10] sm:$0xff] %v1012_v26  ;;  %1246 = vpow2.f32 %v696_v17  ;;  %v593_v37 = vmul.f32 -0.5, %v527_v18  ;;  %v562_v0 = vmul.f32 -0.5, %v496_v62 }
 0x19a   :  { %v1231_v33 = vpop.eup %1230  ;;  %v981_v36 = vadd.f32 %v1625_v41, %v781_v16  ;;  %v750_v58 = vmul.f32 %v1229_v23, %v1623_v40  ;;  %1248 = vpow2.f32 %v634_v27  ;;  %v1692_v32 = vpop.f32.mrb[14].mxu0  ;;  %v497_v17 = vmax.f32 %v1653_v39, 0.0 }
 0x19b   :  { %v1233_v38 = vpop.eup %1232  ;;  %v782_v43 = vmul.f32 %v1231_v33, %v1623_v40  ;;  %v594_v31 = vmul.f32 -0.5, %v528_v30  ;;  %v1694_v44 = vpop.f32.mrb[14].mxu1  ;;  %v698_v49 = vmul.f32 1.442695, %v593_v37  ;;  %v636_v57 = vmul.f32 1.442695, %v562_v0 }
 0x19c   :  { %v1235_v45 = vpop.eup %1234  ;;  %v1045_v46 = vsel %vm915_vm4, %v981_v36, %v781_v16  ;;  %v950_v47 = vadd.f32 %v1625_v41, %v750_v58  ;;  %v751_v48 = vmul.f32 %v1233_v38, %v1623_v40  ;;  %v1701_v51 = vpop.f32.mrb[15].mxu0  ;;  %v529_v23 = vmax.f32 %v1655_v42, 0.0 }
 0x19d   :  { %v1703_v54 = vpop.f32.mrb[15].mxu1  ;;  %v1237_v55 = vpop.eup %1236  ;;  %1109 = vst [vmem:[#allocation9 + $0x118] sm:$0xff] %v1045_v46  ;;  %1110 = vst [vmem:[#allocation9 + $0x120] sm:$0xff] %v782_v43  ;;  %v783_v56 = vmul.f32 %v1235_v45, %v1623_v40  ;;  %v700_v11 = vmul.f32 1.442695, %v594_v31  ;;  %1250 = vpow2.f32 %v698_v49  ;;  %v563_v30 = vmul.f32 -0.5, %v497_v17 }
 0x19e   :  { %v1239_v1 = vpop.eup %1238  ;;  %v1014_v16 = vsel %vm884_vm5, %v950_v47, %v750_v58  ;;  %1079 = vst [vmem:[#allocation9 + $0x28] sm:$0xff] %v751_v48  ;;  %v752_v18 = vmul.f32 %v1237_v55, %v1623_v40  ;;  %1252 = vpow2.f32 %v636_v57  ;;  %v1714_v39 = vpop.f32.mrb[16].mxu0  ;;  %v595_v37 = vmul.f32 -0.5, %v529_v23 }
 0x19f   :  { %v1241_v26 = vpop.eup %1240  ;;  %1078 = vst [vmem:[#allocation9 + $0x20] sm:$0xff] %v1014_v16  ;;  %v983_v27 = vadd.f32 %v1625_v41, %v783_v56  ;;  %v784_v62 = vmul.f32 %v1239_v1, %v1623_v40  ;;  %v1716_v33 = vpop.f32.mrb[16].mxu1  ;;  %1254 = vpow2.f32 %v700_v11  ;;  %v638_v45 = vmul.f32 1.442695, %v563_v30 }
 0x1a0   :  { %v1243_v2 = vpop.eup %1242  ;;  %v952_v36 = vadd.f32 %v1625_v41, %v752_v18  ;;  %v753_v58 = vmul.f32 %v1241_v26, %v1623_v40  ;;  %v1720_v42 = vpop.f32.mrb[17].mxu0  ;;  %v498_v46 = vmax.f32 %v1669_v59, 0.0  ;;  %v702_v49 = vmul.f32 1.442695, %v595_v37 }
 0x1a1   :  { %v1722_v38 = vpop.f32.mrb[17].mxu1  ;;  %v1245_v43 = vpop.eup %1244  ;;  %v1047_v0 = vsel %vm917_vm6, %v983_v27, %v783_v56  ;;  %1112 = vst [vmem:[#allocation9 + $0x130] sm:$0xff] %v784_v62  ;;  %v785_v31 = vmul.f32 %v1243_v2, %v1623_v40  ;;  %v530_v3 = vmax.f32 %v1671_v10, 0.0  ;;  %1256 = vpow2.f32 %v638_v45 }
 0x1a2   :  { %1111 = vst [vmem:[#allocation9 + $0x128] sm:$0xff] %v1047_v0  ;;  %v1016_v47 = vsel %vm886_vm7, %v952_v36, %v752_v18  ;;  %1081 = vst [vmem:[#allocation9 + $0x38] sm:$0xff] %v753_v58  ;;  %v754_v48 = vmul.f32 %v1245_v43, %v1623_v40  ;;  %v564_v59 = vmul.f32 -0.5, %v498_v46  ;;  %v499_v4 = vmax.f32 %v1678_v19, 0.0  ;;  %v1740_v56 = vpop.f32.mrb[18].mxu0  ;;  %v1742_v57 = vpop.f32.mrb[18].mxu1 }
 0x1a3   :  { %1080 = vst [vmem:[#allocation9 + $0x30] sm:$0xff] %v1016_v47  ;;  %v985_v55 = vadd.f32 %v1625_v41, %v785_v31  ;;  %v1247_v11 = vpop.eup %1246  ;;  %1258 = vpow2.f32 %v702_v49  ;;  %v596_v1 = vmul.f32 -0.5, %v530_v3  ;;  %v531_v10 = vmax.f32 %v1680_v22, 0.0  ;;  %v1746_v16 = vpop.f32.mrb[19].mxu0 }
 0x1a4   :  { %v954_v17 = vadd.f32 %v1625_v41, %v754_v48  ;;  %v1748_v18 = vpop.f32.mrb[19].mxu1  ;;  %v1249_v23 = vpop.eup %1248  ;;  %v786_v26 = vmul.f32 %v1247_v11, %v1623_v40  ;;  %v640_v27 = vmul.f32 1.442695, %v564_v59  ;;  %v565_v62 = vmul.f32 -0.5, %v499_v4 }
 0x1a5   :  { %v1049_v19 = vsel %vm919_vm8, %v985_v55, %v785_v31  ;;  %v755_v22 = vmul.f32 %v1249_v23, %v1623_v40  ;;  %v704_v2 = vmul.f32 1.442695, %v596_v1  ;;  %v597_v36 = vmul.f32 -0.5, %v531_v10 }
 0x1a6   :  { %1113 = vst [vmem:[#allocation9 + $0x138] sm:$0xff] %v1049_v19  ;;  %v1018_v30 = vsel %vm888_vm9, %v954_v17, %v754_v48  ;;  %1114 = vst [vmem:[#allocation9 + $0x140] sm:$0xff] %v786_v26  ;;  %1260 = vpow2.f32 %v640_v27  ;;  %v642_v58 = vmul.f32 1.442695, %v565_v62  ;;  %v500_v5 = vmax.f32 %v1692_v32, 0.0  ;;  %v1760_v43 = vpop.f32.mrb[20].mxu0 }
 0x1a7   :  { %1082 = vst [vmem:[#allocation9 + $0x40] sm:$0xff] %v1018_v30  ;;  %v532_v37 = vmax.f32 %v1694_v44, 0.0  ;;  %v1762_v0 = vpop.f32.mrb[20].mxu1  ;;  %v1251_v31 = vpop.eup %1250  ;;  %1083 = vst [vmem:[#allocation9 + $0x48] sm:$0xff] %v755_v22  ;;  %1262 = vpow2.f32 %v704_v2  ;;  %v706_v6 = vmul.f32 1.442695, %v597_v36  ;;  %vm929_vm2 = vcmp.eq.s32.totalorder %v1599_v21, %v1547_v63 }
 0x1a8   :  { %v501_v45 = vmax.f32 %v1701_v51, 0.0  ;;  %v533_v46 = vmax.f32 %v1703_v54, 0.0  ;;  %v1768_v47 = vpop.f32.mrb[21].mxu0  ;;  %v1770_v32 = vpop.f32.mrb[21].mxu1  ;;  %v787_v48 = vmul.f32 %v1251_v31, %v1623_v40  ;;  %1264 = vpow2.f32 %v642_v58 }
 0x1a9   :  { %v1253_v44 = vpop.eup %1252  ;;  %v566_v49 = vmul.f32 -0.5, %v500_v5  ;;  %v598_v3 = vmul.f32 -0.5, %v532_v37  ;;  %1266 = vpow2.f32 %v706_v6  ;;  %v502_v62 = vmax.f32 %v1714_v39, 0.0 }
 0x1aa   :  { %v1255_v55 = vpop.eup %1254  ;;  %v756_v59 = vmul.f32 %v1253_v44, %v1623_v40  ;;  %v567_v4 = vmul.f32 -0.5, %v501_v45  ;;  %v599_v11 = vmul.f32 -0.5, %v533_v46  ;;  %v987_v51 = vadd.f32 %v1625_v41, %v787_v48  ;;  %v1778_v10 = vpop.f32.mrb[22].mxu0 }
 0x1ab   :  { %v788_v54 = vmul.f32 %v1255_v55, %v1623_v40  ;;  %v644_v17 = vmul.f32 1.442695, %v566_v49  ;;  %v708_v1 = vmul.f32 1.442695, %v598_v3  ;;  %v1780_v23 = vpop.f32.mrb[22].mxu1  ;;  %v1784_v30 = vpop.f32.mrb[23].mxu0  ;;  %vm898_vm3 = vcmp.eq.s32.totalorder %v1606_v24, %v1541_v61 }
 0x1ac   :  { %v956_v19 = vadd.f32 %v1625_v41, %v756_v59  ;;  %v646_v26 = vmul.f32 1.442695, %v567_v4  ;;  %v710_v27 = vmul.f32 1.442695, %v599_v11  ;;  %v1257_v22 = vpop.eup %1256  ;;  %v1051_v2 = vsel %vm921_vm10, %v987_v51, %v787_v48  ;;  %v1791_v5 = vpop.f32.mrb[23].mxu1 }
 0x1ad   :  { %1116 = vst [vmem:[#allocation9 + $0x150] sm:$0xff] %v788_v54  ;;  %1268 = vpow2.f32 %v644_v17  ;;  %v534_v36 = vmax.f32 %v1716_v33, 0.0  ;;  %v503_v58 = vmax.f32 %v1720_v42, 0.0  ;;  %v1259_v37 = vpop.eup %1258  ;;  %1115 = vst [vmem:[#allocation9 + $0x148] sm:$0xff] %v1051_v2  ;;  %v757_v31 = vmul.f32 %v1257_v22, %v1623_v40 }
 0x1ae   :  { %v1020_v39 = vsel %vm890_vm11, %v956_v19, %v756_v59  ;;  %1270 = vpow2.f32 %v708_v1  ;;  %v568_v7 = vmul.f32 -0.5, %v502_v62  ;;  %v789_v33 = vmul.f32 %v1259_v37, %v1623_v40  ;;  %v1800_v45 = vpop.f32.mrb[24].mxu0  ;;  %v1802_v46 = vpop.f32.mrb[24].mxu1 }
 0x1af   :  { %1084 = vst [vmem:[#allocation9 + $0x50] sm:$0xff] %v1020_v39  ;;  %1272 = vpow2.f32 %v646_v26  ;;  %v600_v42 = vmul.f32 -0.5, %v534_v36  ;;  %v569_v6 = vmul.f32 -0.5, %v503_v58  ;;  %1085 = vst [vmem:[#allocation9 + $0x58] sm:$0xff] %v757_v31  ;;  %v535_v44 = vmax.f32 %v1722_v38, 0.0  ;;  %v1806_v49 = vpop.f32.mrb[25].mxu0 }
 0x1b0   :  { %1274 = vpow2.f32 %v710_v27  ;;  %v648_v8 = vmul.f32 1.442695, %v568_v7  ;;  %v504_v48 = vmax.f32 %v1740_v56, 0.0  ;;  %v1808_v3 = vpop.f32.mrb[25].mxu1  ;;  %v1261_v55 = vpop.eup %1260  ;;  %v989_v59 = vadd.f32 %v1625_v41, %v789_v33 }
 0x1b1   :  { %v712_v4 = vmul.f32 1.442695, %v600_v42  ;;  %v650_v11 = vmul.f32 1.442695, %v569_v6  ;;  %v536_v51 = vmax.f32 %v1742_v57, 0.0  ;;  %v1263_v54 = vpop.eup %1262  ;;  %v758_v17 = vmul.f32 %v1261_v55, %v1623_v40 }
 0x1b2   :  { %1276 = vpow2.f32 %v648_v8  ;;  %v601_v38 = vmul.f32 -0.5, %v535_v44  ;;  %v570_v56 = vmul.f32 -0.5, %v504_v48  ;;  %v1265_v1 = vpop.eup %1264  ;;  %v1053_v19 = vsel %vm923_vm12, %v989_v59, %v789_v33  ;;  %v1819_v62 = vpop.f32.mrb[26].mxu0 }
 0x1b3   :  { %v790_v26 = vmul.f32 %v1263_v54, %v1623_v40  ;;  %1278 = vpow2.f32 %v712_v4  ;;  %v602_v27 = vmul.f32 -0.5, %v536_v51  ;;  %v1821_v22 = vpop.f32.mrb[26].mxu1  ;;  %v1267_v57 = vpop.eup %1266  ;;  %1117 = vst [vmem:[#allocation9 + $0x158] sm:$0xff] %v1053_v19  ;;  %v958_v2 = vadd.f32 %v1625_v41, %v758_v17 }
 0x1b4   :  { %v759_v36 = vmul.f32 %v1265_v1, %v1623_v40  ;;  %1280 = vpow2.f32 %v650_v11  ;;  %v714_v9 = vmul.f32 1.442695, %v601_v38  ;;  %v1827_v58 = vpop.f32.mrb[27].mxu0  ;;  %v1829_v37 = vpop.f32.mrb[27].mxu1  ;;  %v791_v39 = vmul.f32 %v1267_v57, %v1623_v40 }
 0x1b5   :  { %1118 = vst [vmem:[#allocation9 + $0x160] sm:$0xff] %v790_v26  ;;  %v652_v31 = vmul.f32 1.442695, %v570_v56  ;;  %v716_v7 = vmul.f32 1.442695, %v602_v27  ;;  %v505_v33 = vmax.f32 %v1746_v16, 0.0  ;;  %v1022_v42 = vsel %vm892_vm13, %v958_v2, %v758_v17 }
 0x1b6   :  { %1087 = vst [vmem:[#allocation9 + $0x68] sm:$0xff] %v759_v36  ;;  %1282 = vpow2.f32 %v714_v9  ;;  %v537_v6 = vmax.f32 %v1748_v18, 0.0  ;;  %v506_v8 = vmax.f32 %v1760_v43, 0.0  ;;  %1086 = vst [vmem:[#allocation9 + $0x60] sm:$0xff] %v1022_v42  ;;  %v991_v48 = vadd.f32 %v1625_v41, %v791_v39  ;;  %v1842_v59 = vpop.f32.mrb[28].mxu0  ;;  %v1844_v12 = vpop.f32.mrb[28].mxu1 }
 0x1b7   :  { %v1269_v44 = vpop.eup %1268  ;;  %1284 = vpow2.f32 %v652_v31  ;;  %v571_v55 = vmul.f32 -0.5, %v505_v33  ;;  %v538_v16 = vmax.f32 %v1762_v0, 0.0  ;;  %v1847_v54 = vpop.f32.mrb[29].mxu0  ;;  %v507_v9 = vmax.f32 %v1768_v47, 0.0 }
 0x1b8   :  { %v1271_v4 = vpop.eup %1270  ;;  %v760_v11 = vmul.f32 %v1269_v44, %v1623_v40  ;;  %1286 = vpow2.f32 %v716_v7  ;;  %v603_v51 = vmul.f32 -0.5, %v537_v6  ;;  %v572_v18 = vmul.f32 -0.5, %v506_v8  ;;  %v1849_v43 = vpop.f32.mrb[29].mxu1 }
 0x1b9   :  { %v1273_v17 = vpop.eup %1272  ;;  %v1055_v38 = vsel %vm925_vm14, %v991_v48, %v791_v39  ;;  %v792_v0 = vmul.f32 %v1271_v4, %v1623_v40  ;;  %v654_v56 = vmul.f32 1.442695, %v571_v55  ;;  %v604_v1 = vmul.f32 -0.5, %v538_v16 }
 0x1ba   :  { %v1275_v19 = vpop.eup %1274  ;;  %1119 = vst [vmem:[#allocation9 + $0x168] sm:$0xff] %v1055_v38  ;;  %v960_v26 = vadd.f32 %v1625_v41, %v760_v11  ;;  %v761_v27 = vmul.f32 %v1273_v17, %v1623_v40  ;;  %v718_v57 = vmul.f32 1.442695, %v603_v51  ;;  %v656_v2 = vmul.f32 1.442695, %v572_v18  ;;  %v1863_v39 = vpop.f32.mrb[30].mxu0 }
 0x1bb   :  { %1120 = vst [vmem:[#allocation9 + $0x170] sm:$0xff] %v792_v0  ;;  %v793_v36 = vmul.f32 %v1275_v19, %v1623_v40  ;;  %1288 = vpow2.f32 %v654_v56  ;;  %v720_v13 = vmul.f32 1.442695, %v604_v1  ;;  %v1865_v31 = vpop.f32.mrb[30].mxu1  ;;  %v539_v42 = vmax.f32 %v1770_v32, 0.0  ;;  %v1872_v8 = vpop.f32.mrb[31].mxu0 }
 0x1bc   :  { %v1277_v7 = vpop.eup %1276  ;;  %v1024_v33 = vsel %vm894_vm15, %v960_v26, %v760_v11  ;;  %1089 = vst [vmem:[#allocation9 + $0x78] sm:$0xff] %v761_v27  ;;  %1290 = vpow2.f32 %v718_v57  ;;  %v508_v6 = vmax.f32 %v1778_v10, 0.0  ;;  %v1874_v44 = vpop.f32.mrb[31].mxu1  ;;  %v573_v16 = vmul.f32 -0.5, %v507_v9 }
 0x1bd   :  { %v1279_v47 = vpop.eup %1278  ;;  %1088 = vst [vmem:[#allocation9 + $0x70] sm:$0xff] %v1024_v33  ;;  %v993_v48 = vadd.f32 %v1625_v41, %v793_v36  ;;  %v762_v55 = vmul.f32 %v1277_v7, %v1623_v40  ;;  %1292 = vpow2.f32 %v656_v2  ;;  %v605_v11 = vmul.f32 -0.5, %v539_v42 }
 0x1be   :  { %v1281_v14 = vpop.eup %1280  ;;  %v794_v4 = vmul.f32 %v1279_v47, %v1623_v40  ;;  %1294 = vpow2.f32 %v720_v13  ;;  %v574_v32 = vmul.f32 -0.5, %v508_v6  ;;  %v658_v17 = vmul.f32 1.442695, %v573_v16 }
 0x1bf   :  { %v1057_v10 = vsel %vm927_vm0, %v993_v48, %v793_v36  ;;  %v962_v51 = vadd.f32 %v1625_v41, %v762_v55  ;;  %v763_v18 = vmul.f32 %v1281_v14, %v1623_v40  ;;  %vm931_vm4 = vcmp.eq.s32.totalorder %v1609_v25, %v1547_v63 }
 0x1c0   :  { %v1283_v38 = vpop.eup %1282  ;;  %1121 = vst [vmem:[#allocation9 + $0x178] sm:$0xff] %v1057_v10  ;;  %1122 = vst [vmem:[#allocation9 + $0x180] sm:$0xff] %v794_v4  ;;  %v722_v0 = vmul.f32 1.442695, %v605_v11  ;;  %v660_v56 = vmul.f32 1.442695, %v574_v32  ;;  %vm900_vm5 = vcmp.eq.s32.totalorder %v1612_v28, %v1541_v61  ;;  %1296 = vpow2.f32 %v658_v17 }
 0x1c1   :  { %v540_v1 = vmax.f32 %v1780_v23, 0.0  ;;  %v509_v19 = vmax.f32 %v1784_v30, 0.0  ;;  %v1285_v26 = vpop.eup %1284  ;;  %v1026_v15 = vsel %vm896_vm1, %v962_v51, %v762_v55  ;;  %1091 = vst [vmem:[#allocation9 + $0x88] sm:$0xff] %v763_v18  ;;  %v795_v27 = vmul.f32 %v1283_v38, %v1623_v40 }
 0x1c2   :  { %v541_v57 = vmax.f32 %v1791_v5, 0.0  ;;  %v1287_v2 = vpop.eup %1286  ;;  %1090 = vst [vmem:[#allocation9 + $0x80] sm:$0xff] %v1026_v15  ;;  %v764_v23 = vmul.f32 %v1285_v26, %v1623_v40  ;;  %1298 = vpow2.f32 %v722_v0  ;;  %v510_v6 = vmax.f32 %v1800_v45, 0.0 }
 0x1c3   :  { %v606_v30 = vmul.f32 -0.5, %v540_v1  ;;  %v575_v36 = vmul.f32 -0.5, %v509_v19  ;;  %v995_v13 = vadd.f32 %v1625_v41, %v795_v27  ;;  %v796_v20 = vmul.f32 %v1287_v2, %v1623_v40 }
 0x1c4   :  { %1300 = vpow2.f32 %v660_v56  ;;  %v607_v9 = vmul.f32 -0.5, %v541_v57  ;;  %v964_v7 = vadd.f32 %v1625_v41, %v764_v23  ;;  %v542_v55 = vmax.f32 %v1802_v46, 0.0 }
 0x1c5   :  { %v724_v33 = vmul.f32 1.442695, %v606_v30  ;;  %v662_v42 = vmul.f32 1.442695, %v575_v36  ;;  %v1289_v5 = vpop.eup %1288  ;;  %v1059_v47 = vsel %vm929_vm2, %v995_v13, %v795_v27  ;;  %1124 = vst [vmem:[#allocation9 + $0x190] sm:$0xff] %v796_v20  ;;  %v511_v16 = vmax.f32 %v1806_v49, 0.0 }
 0x1c6   :  { %v726_v48 = vmul.f32 1.442695, %v607_v9  ;;  %v1291_v14 = vpop.eup %1290  ;;  %1123 = vst [vmem:[#allocation9 + $0x188] sm:$0xff] %v1059_v47  ;;  %v1028_v4 = vsel %vm898_vm3, %v964_v7, %v764_v23  ;;  %v765_v11 = vmul.f32 %v1289_v5, %v1623_v40  ;;  %vm933_vm6 = vcmp.eq.s32.totalorder %v1615_v29, %v1547_v63 }
 0x1c7   :  { %1302 = vpow2.f32 %v724_v33  ;;  %v576_v21 = vmul.f32 -0.5, %v510_v6  ;;  %v1293_v45 = vpop.eup %1292  ;;  %1092 = vst [vmem:[#allocation9 + $0x90] sm:$0xff] %v1028_v4  ;;  %v797_v32 = vmul.f32 %v1291_v14, %v1623_v40  ;;  %vm902_vm7 = vcmp.eq.s32.totalorder %v1618_v34, %v1541_v61 }
 0x1c8   :  { %1304 = vpow2.f32 %v662_v42  ;;  %v608_v46 = vmul.f32 -0.5, %v542_v55  ;;  %v577_v49 = vmul.f32 -0.5, %v511_v16  ;;  %v1295_v10 = vpop.eup %1294  ;;  %1093 = vst [vmem:[#allocation9 + $0x98] sm:$0xff] %v765_v11  ;;  %v766_v24 = vmul.f32 %v1293_v45, %v1623_v40 }
 0x1c9   :  { %1306 = vpow2.f32 %v726_v48  ;;  %v664_v51 = vmul.f32 1.442695, %v576_v21  ;;  %v543_v18 = vmax.f32 %v1808_v3, 0.0  ;;  %v997_v17 = vadd.f32 %v1625_v41, %v797_v32 }
 0x1ca   :  { %v798_v38 = vmul.f32 %v1295_v10, %v1623_v40  ;;  %v728_v0 = vmul.f32 1.442695, %v608_v46  ;;  %v666_v56 = vmul.f32 1.442695, %v577_v49  ;;  %v966_v1 = vadd.f32 %v1625_v41, %v766_v24  ;;  %v1297_v15 = vpop.eup %1296 }
 0x1cb   :  { %1308 = vpow2.f32 %v664_v51  ;;  %v609_v19 = vmul.f32 -0.5, %v543_v18  ;;  %v512_v26 = vmax.f32 %v1819_v62, 0.0  ;;  %v1061_v27 = vsel %vm931_vm4, %v997_v17, %v797_v32 }
 0x1cc   :  { %1126 = vst [vmem:[#allocation9 + $0x1a0] sm:$0xff] %v798_v38  ;;  %1310 = vpow2.f32 %v728_v0  ;;  %v544_v3 = vmax.f32 %v1821_v22, 0.0  ;;  %v513_v57 = vmax.f32 %v1827_v58, 0.0  ;;  %v1299_v2 = vpop.eup %1298  ;;  %1125 = vst [vmem:[#allocation9 + $0x198] sm:$0xff] %v1061_v27  ;;  %v1030_v23 = vsel %vm900_vm5, %v966_v1, %v766_v24 }
 0x1cd   :  { %v767_v30 = vmul.f32 %v1297_v15, %v1623_v40  ;;  %vm935_vm8 = vcmp.eq.s32.totalorder %v1621_v35, %v1547_v63  ;;  %1312 = vpow2.f32 %v666_v56  ;;  %v730_v25 = vmul.f32 1.442695, %v609_v19  ;;  %1094 = vst [vmem:[#allocation9 + $0xa0] sm:$0xff] %v1030_v23 }
 0x1ce   :  { %v1301_v62 = vpop.eup %1300  ;;  %v799_v36 = vmul.f32 %v1299_v2, %v1623_v40  ;;  %v578_v22 = vmul.f32 -0.5, %v512_v26  ;;  %v610_v13 = vmul.f32 -0.5, %v544_v3  ;;  %v579_v58 = vmul.f32 -0.5, %v513_v57 }
 0x1cf   :  { %1095 = vst [vmem:[#allocation9 + $0xa8] sm:$0xff] %v767_v30  ;;  %v768_v20 = vmul.f32 %v1301_v62, %v1623_v40  ;;  %vm904_vm9 = vcmp.eq.s32.totalorder %v1628_v52, %v1541_v61  ;;  %1314 = vpow2.f32 %v730_v25  ;;  %v545_v28 = vmax.f32 %v1829_v37, 0.0 }
 0x1d0   :  { %v514_v9 = vmax.f32 %v1842_v59, 0.0  ;;  %v999_v7 = vadd.f32 %v1625_v41, %v799_v36  ;;  %v668_v33 = vmul.f32 1.442695, %v578_v22  ;;  %v732_v42 = vmul.f32 1.442695, %v610_v13 }
 0x1d1   :  { %v670_v6 = vmul.f32 1.442695, %v579_v58  ;;  %v1303_v5 = vpop.eup %1302  ;;  %v968_v47 = vadd.f32 %v1625_v41, %v768_v20  ;;  %v611_v48 = vmul.f32 -0.5, %v545_v28  ;;  %v546_v16 = vmax.f32 %v1844_v12, 0.0 }
 0x1d2   :  { %v580_v55 = vmul.f32 -0.5, %v514_v9  ;;  %v1305_v14 = vpop.eup %1304  ;;  %v1063_v4 = vsel %vm933_vm6, %v999_v7, %v799_v36  ;;  %v800_v37 = vmul.f32 %v1303_v5, %v1623_v40  ;;  %1316 = vpow2.f32 %v668_v33 }
 0x1d3   :  { %v515_v59 = vmax.f32 %v1847_v54, 0.0  ;;  %v1307_v11 = vpop.eup %1306  ;;  %1127 = vst [vmem:[#allocation9 + $0x1a8] sm:$0xff] %v1063_v4  ;;  %v1032_v21 = vsel %vm902_vm7, %v968_v47, %v768_v20  ;;  %v769_v45 = vmul.f32 %v1305_v14, %v1623_v40  ;;  %1318 = vpow2.f32 %v732_v42 }
 0x1d4   :  { %v734_v12 = vmul.f32 1.442695, %v611_v48  ;;  %1096 = vst [vmem:[#allocation9 + $0xb0] sm:$0xff] %v1032_v21  ;;  %1128 = vst [vmem:[#allocation9 + $0x1b0] sm:$0xff] %v800_v37  ;;  %v801_v29 = vmul.f32 %v1307_v11, %v1623_v40  ;;  %1320 = vpow2.f32 %v670_v6  ;;  %v672_v32 = vmul.f32 1.442695, %v580_v55 }
 0x1d5   :  { %v612_v46 = vmul.f32 -0.5, %v546_v16  ;;  %v1309_v49 = vpop.eup %1308  ;;  %1097 = vst [vmem:[#allocation9 + $0xb8] sm:$0xff] %v769_v45  ;;  %v581_v54 = vmul.f32 -0.5, %v515_v59  ;;  %v547_v10 = vmax.f32 %v1849_v43, 0.0  ;;  %v516_v34 = vmax.f32 %v1863_v39, 0.0 }
 0x1d6   :  { %1322 = vpow2.f32 %v734_v12  ;;  %v1311_v24 = vpop.eup %1310  ;;  %v1001_v51 = vadd.f32 %v1625_v41, %v801_v29  ;;  %v770_v18 = vmul.f32 %v1309_v49, %v1623_v40  ;;  %v548_v57 = vmax.f32 %v1865_v31, 0.0 }
 0x1d7   :  { %1324 = vpow2.f32 %v672_v32  ;;  %v736_v17 = vmul.f32 1.442695, %v612_v46  ;;  %v1313_v38 = vpop.eup %1312  ;;  %v802_v0 = vmul.f32 %v1311_v24, %v1623_v40  ;;  %v674_v56 = vmul.f32 1.442695, %v581_v54 }
 0x1d8   :  { %v613_v1 = vmul.f32 -0.5, %v547_v10  ;;  %v582_v19 = vmul.f32 -0.5, %v516_v34  ;;  %v1065_v26 = vsel %vm935_vm8, %v1001_v51, %v801_v29  ;;  %v970_v43 = vadd.f32 %v1625_v41, %v770_v18 }
 0x1d9   :  { %v771_v39 = vmul.f32 %v1313_v38, %v1623_v40  ;;  %1326 = vpow2.f32 %v736_v17  ;;  %v1315_v15 = vpop.eup %1314  ;;  %1129 = vst [vmem:[#allocation9 + $0x1b8] sm:$0xff] %v1065_v26  ;;  %1130 = vst [vmem:[#allocation9 + $0x1c0] sm:$0xff] %v802_v0  ;;  %v517_v23 = vmax.f32 %v1872_v8, 0.0  ;;  %v549_v30 = vmax.f32 %v1874_v44, 0.0 }
 0x1da   :  { %1328 = vpow2.f32 %v674_v56  ;;  %v738_v27 = vmul.f32 1.442695, %v613_v1  ;;  %v676_v3 = vmul.f32 1.442695, %v582_v19  ;;  %v1034_v2 = vsel %vm904_vm9, %v970_v43, %v770_v18 }
 0x1db   :  { %1099 = vst [vmem:[#allocation9 + $0xc8] sm:$0xff] %v771_v39  ;;  %v803_v35 = vmul.f32 %v1315_v15, %v1623_v40  ;;  %1098 = vst [vmem:[#allocation9 + $0xc0] sm:$0xff] %v1034_v2  ;;  %vm937_vm10 = vcmp.eq.s32.totalorder %v1631_v53, %v1547_v63  ;;  %vm906_vm11 = vcmp.eq.s32.totalorder %v1640_v50, %v1541_v61  ;;  %v614_v31 = vmul.f32 -0.5, %v548_v57 }
 0x1dc   :  { %1330 = vpow2.f32 %v738_v27  ;;  %v1317_v25 = vpop.eup %1316  ;;  %v583_v62 = vmul.f32 -0.5, %v517_v23  ;;  %v615_v36 = vmul.f32 -0.5, %v549_v30  ;;  %v841_v44 = vadd.s32 232, %v1539_v60 }
 0x1dd   :  { %v1003_v52 = vadd.f32 %v1625_v41, %v803_v35  ;;  %1332 = vpow2.f32 %v676_v3  ;;  %v1319_v22 = vpop.eup %1318  ;;  %v772_v8 = vmul.f32 %v1317_v25, %v1623_v40  ;;  %v826_v13 = vadd.s32 112, %v1539_v60 }
 0x1de   :  { %v740_v58 = vmul.f32 1.442695, %v614_v31  ;;  %v1321_v53 = vpop.eup %1320  ;;  %v804_v28 = vmul.f32 %v1319_v22, %v1623_v40  ;;  %v678_v9 = vmul.f32 1.442695, %v583_v62  ;;  %v742_v7 = vmul.f32 1.442695, %v615_v36 }
 0x1df   :  { %v1067_v20 = vsel %vm937_vm10, %v1003_v52, %v803_v35  ;;  %v972_v42 = vadd.f32 %v1625_v41, %v772_v8  ;;  %v773_v6 = vmul.f32 %v1321_v53, %v1623_v40  ;;  %vm939_vm12 = vcmp.eq.s32.totalorder %v841_v44, %v1547_v63 }
 0x1e0   :  { %v1323_v33 = vpop.eup %1322  ;;  %1131 = vst [vmem:[#allocation9 + $0x1c8] sm:$0xff] %v1067_v20  ;;  %1334 = vpow2.f32 %v740_v58  ;;  %1132 = vst [vmem:[#allocation9 + $0x1d0] sm:$0xff] %v804_v28  ;;  %vm908_vm13 = vcmp.eq.s32.totalorder %v826_v13, %v1541_v61  ;;  %v842_v50 = vadd.s32 240, %v1539_v60  ;;  %v827_v45 = vadd.s32 120, %v1539_v60 }
 0x1e1   :  { %v1325_v5 = vpop.eup %1324  ;;  %v805_v47 = vmul.f32 %v1323_v33, %v1623_v40  ;;  %1336 = vpow2.f32 %v678_v9  ;;  %v1036_v48 = vsel %vm906_vm11, %v972_v42, %v772_v8  ;;  %1101 = vst [vmem:[#allocation9 + $0xd8] sm:$0xff] %v773_v6  ;;  %v843_v24 = vadd.s32 248, %v1539_v60 }
 0x1e2   :  { %v774_v55 = vmul.f32 %v1325_v5, %v1623_v40  ;;  %1338 = vpow2.f32 %v742_v7  ;;  %1100 = vst [vmem:[#allocation9 + $0xd0] sm:$0xff] %v1036_v48  ;;  %vm941_vm14 = vcmp.eq.s32.totalorder %v842_v50, %v1547_v63  ;;  %vm910_vm15 = vcmp.eq.s32.totalorder %v827_v45, %v1541_v61 }
 0x1e3   :  { %v1327_v16 = vpop.eup %1326  ;;  %v1005_v14 = vadd.f32 %v1625_v41, %v805_v47  ;;  %vm943_vm0 = vcmp.eq.s32.totalorder %v843_v24, %v1547_v63 }
 0x1e4   :  { %v1329_v4 = vpop.eup %1328  ;;  %v974_v37 = vadd.f32 %v1625_v41, %v774_v55  ;;  %v806_v59 = vmul.f32 %v1327_v16, %v1623_v40 }
 0x1e5   :  { %v1069_v11 = vsel %vm939_vm12, %v1005_v14, %v805_v47  ;;  %v775_v21 = vmul.f32 %v1329_v4, %v1623_v40 }
 0x1e6   :  { %v1331_v12 = vpop.eup %1330  ;;  %1133 = vst [vmem:[#allocation9 + $0x1d8] sm:$0xff] %v1069_v11  ;;  %v1038_v29 = vsel %vm908_vm13, %v974_v37, %v774_v55  ;;  %1134 = vst [vmem:[#allocation9 + $0x1e0] sm:$0xff] %v806_v59 }
 0x1e7   :  { %v1333_v32 = vpop.eup %1332  ;;  %1102 = vst [vmem:[#allocation9 + $0xe0] sm:$0xff] %v1038_v29  ;;  %1103 = vst [vmem:[#allocation9 + $0xe8] sm:$0xff] %v775_v21  ;;  %v807_v46 = vmul.f32 %v1331_v12, %v1623_v40 }
 0x1e8   :  { %v776_v49 = vmul.f32 %v1333_v32, %v1623_v40 }
 0x1e9   :  { %v1007_v54 = vadd.f32 %v1625_v41, %v807_v46 }
 0x1ea   :  { %v1335_v10 = vpop.eup %1334  ;;  %v976_v34 = vadd.f32 %v1625_v41, %v776_v49 }
 0x1eb   :  { %v1337_v51 = vpop.eup %1336  ;;  %v1071_v18 = vsel %vm941_vm14, %v1007_v54, %v807_v46  ;;  %v808_v17 = vmul.f32 %v1335_v10, %v1623_v40 }
 0x1ec   :  { %v1339_v38 = vpop.eup %1338  ;;  %1135 = vst [vmem:[#allocation9 + $0x1e8] sm:$0xff] %v1071_v18  ;;  %v1040_v0 = vsel %vm910_vm15, %v976_v34, %v776_v49  ;;  %v777_v56 = vmul.f32 %v1337_v51, %v1623_v40 }
 0x1ed   :  { %1104 = vst [vmem:[#allocation9 + $0xf0] sm:$0xff] %v1040_v0  ;;  %1136 = vst [vmem:[#allocation9 + $0x1f0] sm:$0xff] %v808_v17  ;;  %v809_v1 = vmul.f32 %v1339_v38, %v1623_v40 }
 0x1ee   :  { %1105 = vst [vmem:[#allocation9 + $0xf8] sm:$0xff] %v777_v56 }
 0x1ef   :  { %v1009_v60 = vadd.f32 %v1625_v41, %v809_v1 }
 0x1f1   :  { %v1073_v61 = vsel %vm943_vm0, %v1009_v60, %v809_v1 }
 0x1f2   :  { %1137 = vst [vmem:[#allocation9 + $0x1f8] sm:$0xff] %v1073_v61 }
 0x1f3   :  { %1395 = shalt.err (!%p1392_p6)
}
 0x1f4   :  { %s1396_s22 = scalar_lea.hbm %s2022_s4, 8192 }
 0x1f5   :  { %p1397_p7 = scmp.ne.s32.totalorder %s2022_s4, %s1396_s22  ;;  %p1400_p8 = scmp.lt.u32.totalorder %s1396_s22, %s2022_s4 }
 0x1f7   :  { %p1402_p9 = pnand %p1400_p8, %p1397_p7 }
 0x1f9   :  { %1405 = shalt.err (!%p1402_p9)
}
 0x1fa   :  { %1149 = dma.vmem_to_hbm [thread:$0]  %s1144_s1, 8192, %s2022_s4, [#allocation6], %s1413_s25, %s1413_s25, %s1414_s26  }
 0x1fb   :  { %1410 = dma.done.wait [#allocation6], 8192  }
 0x1fc   :  { %1411 = vsyncadd [#allocation6], 4294959104 }
 0x1fd   :  { %1153 = vsyncpa [#allocation5], 1 }
 0x1fe   :  { %1154 = vsyncpa [#allocation8], 1 }
 0x1ff   :  { %1155 = vsyncpa [#allocation6], 1 }

</bundles_post_ra>
